<compile_context>
chip_gen: v6e
topology: v6e:2x2x1
jax: 0.10.0
libtpu: 0.0.40
codegen_flags: <defaults>
</compile_context>

<pallas_src>
import jax
import jax.numpy as jnp
from jax import lax
from jax.experimental import pallas as pl
from jax.experimental.pallas import tpu as pltpu


def _round_up(n, m):
    return ((n + m - 1) // m) * m


def classifier_kernel(xt_ref, w1_ref, b1_ref, w2_ref, b2_ref, out_ref):
    # hidden^T = relu(W1 @ x^T + b1)           [h_dim, tb]  (lane axis = batch)
    h = jnp.dot(w1_ref[...], xt_ref[...], preferred_element_type=jnp.float32)
    h = jnp.maximum(h + b1_ref[...], 0.0)

    # logits^T = W2 @ hidden^T + b2            [y_dim, tb]
    logits = jnp.dot(w2_ref[...], h, preferred_element_type=jnp.float32)
    logits = logits + b2_ref[...]

    # Numerically-stable softmax over classes (axis 0 = sublanes).  Every vreg
    # here is fully lane-dense over the batch and the final store is unmasked.
    m = jnp.max(logits, axis=0, keepdims=True)
    e = jnp.exp(logits - m)
    denom = jnp.sum(e, axis=0, keepdims=True)
    out_ref[...] = (e / denom).astype(out_ref.dtype)   # exact normalisation


def classifier_forward(x, w1, b1, w2, b2, *, block_b=4096):
    """Fused dense -> ReLU -> dense -> softmax.

    x : [B, x_dim]; w1 : [h_dim, x_dim]; b1 : [h_dim];
    w2 : [y_dim, h_dim]; b2 : [y_dim]   (torch nn.Linear layout)
    returns [B, y_dim] float32 softmax probabilities.
    """
    B, x_dim = x.shape
    h_dim = w1.shape[0]
    y_dim = w2.shape[0]

    # Feature-major operands: batch on the lane (last) axis.
    xt = x.astype(jnp.float32).T                      # [x_dim, B]
    w1f = w1.astype(jnp.float32)                      # [h_dim, x_dim]
    w2f = w2.astype(jnp.float32)                      # [y_dim, h_dim]
    b1c = b1.astype(jnp.float32).reshape(h_dim, 1)
    b2c = b2.astype(jnp.float32).reshape(y_dim, 1)

    def cost(b_rows):
        return pl.CostEstimate(
            flops=2 * b_rows * (x_dim * h_dim + h_dim * y_dim),
            transcendentals=b_rows * y_dim,
            bytes_accessed=4 * (x_dim * b_rows + x_dim * h_dim + h_dim
                                + h_dim * y_dim + y_dim + y_dim * b_rows),
        )

    num_tiles = pl.cdiv(B, block_b)

    if num_tiles == 1:
        # Grid-less fast path: whole problem is one VMEM block -> no padding,
        # no double-buffering, no per-step pipeline overhead.
        out_t = pl.pallas_call(
            classifier_kernel,
            out_shape=jax.ShapeDtypeStruct((y_dim, B), jnp.float32),
            cost_estimate=cost(B),
        )(xt, w1f, b1c, w2f, b2c)
        return out_t.T

    # Gridded path: >= 4 tiles (>= 2 per TensorCore on v7x), tile size chosen
    # to minimise padding (at most one partial 128-lane group of batch rows).
    num_tiles = max(num_tiles, 4)
    if num_tiles % 2:
        num_tiles += 1
    tb = _round_up(pl.cdiv(B, num_tiles), 128)
    num_tiles = pl.cdiv(B, tb)           # drop tiles emptied by rounding
    B_pad = num_tiles * tb
    if B_pad != B:
        xt = jnp.pad(xt, ((0, 0), (0, B_pad - B)))

    out_t = pl.pallas_call(
        classifier_kernel,
        out_shape=jax.ShapeDtypeStruct((y_dim, B_pad), jnp.float32),
        grid=(num_tiles,),
        in_specs=[
            pl.BlockSpec((x_dim, tb), lambda i: (0, i)),
            pl.BlockSpec((h_dim, x_dim), lambda i: (0, 0)),   # VMEM-resident
            pl.BlockSpec((h_dim, 1), lambda i: (0, 0)),       # VMEM-resident
            pl.BlockSpec((y_dim, h_dim), lambda i: (0, 0)),   # VMEM-resident
            pl.BlockSpec((y_dim, 1), lambda i: (0, 0)),       # VMEM-resident
        ],
        out_specs=pl.BlockSpec((y_dim, tb), lambda i: (0, i)),
        compiler_params=pltpu.CompilerParams(
            dimension_semantics=("parallel",)),               # dual-TC on v7x
        cost_estimate=cost(B_pad),
    )(xt, w1f, b1c, w2f, b2c)
    return out_t[:, :B].T


def reference_forward(x, w1, b1, w2, b2):
    """Pure-JAX f32 reference (matches the PyTorch module)."""
    h = jnp.maximum(
        jnp.dot(x, w1.T, precision=lax.Precision.HIGHEST) + b1, 0.0)
    logits = jnp.dot(h, w2.T, precision=lax.Precision.HIGHEST) + b2
    return jax.nn.softmax(logits, axis=-1)


def init_params(key, x_dim, h_dim, y_dim):
    """nn.Linear-style init (uniform +-1/sqrt(fan_in)), torch [out, in] layout."""
    k1, k2, k3, k4 = jax.random.split(key, 4)
    bound1 = 1.0 / jnp.sqrt(jnp.float32(x_dim))
    bound2 = 1.0 / jnp.sqrt(jnp.float32(h_dim))
    w1 = jax.random.uniform(k1, (h_dim, x_dim), jnp.float32, -bound1, bound1)
    b1 = jax.random.uniform(k2, (h_dim,), jnp.float32, -bound1, bound1)
    w2 = jax.random.uniform(k3, (y_dim, h_dim), jnp.float32, -bound2, bound2)
    b2 = jax.random.uniform(k4, (y_dim,), jnp.float32, -bound2, bound2)
    return w1, b1, w2, b2


if __name__ == "__main__":
    # dims = [x_dim, h_dim, y_dim]
    x_dim, h_dim, y_dim = 32, 64, 16

    key = jax.random.PRNGKey(0)
    kp, kx1, kx2, kx3 = jax.random.split(key, 4)
    w1, b1, w2, b2 = init_params(kp, x_dim, h_dim, y_dim)

    # Exercise all code paths:
    #   B=8            -> tiny grid-less block
    #   B=600          -> single un-padded block (the old version padded to 1024)
    #   B=600, tb cap  -> gridded path: 5 tiles of 128 rows, parallel batch axis
    cases = [
        (8, kx1, {}),
        (600, kx2, {}),
        (600, kx3, {"block_b": 128}),
    ]
    for B, kx, kw in cases:
        x = jax.random.normal(kx, (B, x_dim), jnp.float32)
        out = jax.block_until_ready(classifier_forward(x, w1, b1, w2, b2, **kw))
        ref = reference_forward(x, w1, b1, w2, b2)

        assert out.shape == (B, y_dim), (out.shape, (B, y_dim))
        assert bool(jnp.all(jnp.isfinite(out)))
        assert jnp.allclose(out, ref, atol=5e-3, rtol=5e-3), (
            float(jnp.max(jnp.abs(out - ref))))
        # exact normalisation in-kernel -> rows sum to 1 to f32 precision
        assert jnp.allclose(jnp.sum(out, axis=-1), 1.0, atol=1e-3)

    print("KERNEL_OK")
</pallas_src>

<mosaic_0001>
module attributes {stable_mosaic.version = 11 : i64} {
  func.func @classifier_kernel(%arg0: memref<32x8xf32, #tpu.memory_space<vmem>>, %arg1: memref<64x32xf32, #tpu.memory_space<vmem>>, %arg2: memref<64x1xf32, #tpu.memory_space<vmem>>, %arg3: memref<16x64xf32, #tpu.memory_space<vmem>>, %arg4: memref<16x1xf32, #tpu.memory_space<vmem>>, %arg5: memref<16x8xf32, #tpu.memory_space<vmem>>) attributes {dimension_semantics = [], scalar_prefetch = 0 : i64, scratch_operands = 0 : i64, tpu.core_type = #tpu.core_type<tc>} {
    %c0 = arith.constant 0 : index
    %c0_0 = arith.constant 0 : index
    %0 = vector.load %arg1[%c0, %c0_0] : memref<64x32xf32, #tpu.memory_space<vmem>>, vector<64x32xf32>
    %c0_1 = arith.constant 0 : index
    %c0_2 = arith.constant 0 : index
    %1 = vector.load %arg0[%c0_1, %c0_2] : memref<32x8xf32, #tpu.memory_space<vmem>>, vector<32x8xf32>
    %cst = arith.constant dense<0.000000e+00> : vector<64x8xf32>
    %2 = tpu.matmul %0, %1, %cst {dimension_numbers = #tpu.dot_dimension_numbers<[1], [0], [0], [1], [0, 0, 1, 1], [], []>} : vector<64x32xf32>, vector<32x8xf32>, vector<64x8xf32> -> vector<64x8xf32>
    %c0_3 = arith.constant 0 : index
    %c0_4 = arith.constant 0 : index
    %3 = vector.load %arg2[%c0_3, %c0_4] : memref<64x1xf32, #tpu.memory_space<vmem>>, vector<64x1xf32>
    %4 = vector.broadcast %3 : vector<64x1xf32> to vector<64x8xf32>
    %5 = arith.addf %2, %4 : vector<64x8xf32>
    %cst_5 = arith.constant 0.000000e+00 : f32
    %6 = vector.broadcast %cst_5 : f32 to vector<64x8xf32>
    %7 = arith.maximumf %5, %6 : vector<64x8xf32>
    %c0_6 = arith.constant 0 : index
    %c0_7 = arith.constant 0 : index
    %8 = vector.load %arg3[%c0_6, %c0_7] : memref<16x64xf32, #tpu.memory_space<vmem>>, vector<16x64xf32>
    %cst_8 = arith.constant dense<0.000000e+00> : vector<16x8xf32>
    %9 = tpu.matmul %8, %7, %cst_8 {dimension_numbers = #tpu.dot_dimension_numbers<[1], [0], [0], [1], [0, 0, 1, 1], [], []>} : vector<16x64xf32>, vector<64x8xf32>, vector<16x8xf32> -> vector<16x8xf32>
    %c0_9 = arith.constant 0 : index
    %c0_10 = arith.constant 0 : index
    %10 = vector.load %arg4[%c0_9, %c0_10] : memref<16x1xf32, #tpu.memory_space<vmem>>, vector<16x1xf32>
    %11 = vector.broadcast %10 : vector<16x1xf32> to vector<16x8xf32>
    %12 = arith.addf %9, %11 : vector<16x8xf32>
    %cst_11 = arith.constant dense<0xFF800000> : vector<8xf32>
    %13 = vector.multi_reduction <maximumf>, %12, %cst_11 [0] : vector<16x8xf32> to vector<8xf32>
    %14 = vector.shape_cast %13 : vector<8xf32> to vector<1x8xf32>
    %15 = vector.broadcast %14 : vector<1x8xf32> to vector<16x8xf32>
    %16 = arith.subf %12, %15 : vector<16x8xf32>
    %17 = math.exp %16 : vector<16x8xf32>
    %cst_12 = arith.constant dense<0.000000e+00> : vector<8xf32>
    %18 = vector.multi_reduction <add>, %17, %cst_12 [0] : vector<16x8xf32> to vector<8xf32>
    %19 = vector.shape_cast %18 : vector<8xf32> to vector<1x8xf32>
    %20 = vector.broadcast %19 : vector<1x8xf32> to vector<16x8xf32>
    %21 = arith.divf %17, %20 : vector<16x8xf32>
    %c0_13 = arith.constant 0 : index
    %c0_14 = arith.constant 0 : index
    %22 = vector.load %arg5[%c0_13, %c0_14] : memref<16x8xf32, #tpu.memory_space<vmem>>, vector<16x8xf32>
    tpu.vector_store %arg5[%c0_13, %c0_14], %21 {strides = array<i32>} : memref<16x8xf32, #tpu.memory_space<vmem>>, vector<16x8xf32>,
    return
  }
}

</mosaic_0001>

<bundles_post_ra>
// kernel: tpu_custom_call.1
= control target key start
LH: loop header
LB: loop body
LE: loop exit
PB: predicated region body
PF: predicated region fallthrough
CT: control target
= control target key end

     0   :  { %vm80_vm0 = vcmask 261120   ;;  %v428_v2 = vmov 0   ;;  %vm232_vm1 = vcmask 523264   ;;  %vm314_vm2 = vcmask 64512   ;;  %s553_s0 = inlined_call_operand.vmem [shape: f32[32,8], index: 0, kind: input, shape index: {}]   ;;  %s554_s1 = inlined_call_operand.vmem [shape: f32[64,32], index: 1, kind: input, shape index: {}]   ;;  %s555_s2 = inlined_call_operand.vmem [shape: f32[64,1], index: 2, kind: input, shape index: {}]   ;;  %s556_s4 = inlined_call_operand.vmem [shape: f32[16,1], index: 4, kind: input, shape index: {}]   ;;  %s557_s3 = inlined_call_operand.vmem [shape: f32[16,64], index: 3, kind: input, shape index: {}]   ;;  %s558_s5 = inlined_call_operand.vmem [shape: f32[16,8], index: 5, kind: output, shape index: {}]  }
   0x1   :  { %v31_v0 = vld [vmem:[%s553_s0 + $0x18] sm:$0xff]  ;;  %v30_v1 = vld [vmem:[%s553_s0 + $0x10] sm:$0xff]  ;;  %420 = vset.pattern.permute.xlu0 %v428_v2  ;;  %421 = vset.pattern.permute.xlu1 %v428_v2  ;;  %v20_v3 = vld [vmem:[%s554_s1] sm:$0xff] }
   0x2   :  { %380 = vmatprep.subr.mxu0 %v31_v0  ;;  %v29_v4 = vld [vmem:[%s553_s0 + $0x8] sm:$0xff]  ;;  %388 = vmatprep.mubr.msk.f32.mxu0 %vm80_vm0, %v20_v3  ;;  %v28_v5 = vld [vmem:[%s553_s0] sm:$0xff]  ;;  %v39_v6 = vld [vmem:[%s555_s2 + $0x38] sm:$0xff] }
   0x3   :  { %381 = vmatpush3.msra.mxu0 %v31_v0  ;;  %v37_v7 = vld [vmem:[%s555_s2 + $0x28] sm:$0xff]  ;;  %77 = vperm.xlu0 %420, %v39_v6   ;;  %v38_v9 = vld [vmem:[%s555_s2 + $0x30] sm:$0xff]  ;;  %v36_v11 = vld [vmem:[%s555_s2 + $0x20] sm:$0xff] }
   0x4   :  { %382 = vmatprep.subr.mxu0 %v30_v1  ;;  %v21_v8 = vld [vmem:[%s554_s1 + $0x8] sm:$0xff]  ;;  %67 = vperm.xlu1 %421, %v37_v7   ;;  %v22_v10 = vld [vmem:[%s554_s1 + $0x10] sm:$0xff]  ;;  %v23_v12 = vld [vmem:[%s554_s1 + $0x18] sm:$0xff] }
   0x5   :  { %383 = vmatpush3.msra.mxu0 %v30_v1  ;;  %v35_v13 = vld [vmem:[%s555_s2 + $0x18] sm:$0xff]  ;;  %v24_v14 = vld [vmem:[%s554_s1 + $0x20] sm:$0xff]  ;;  %v34_v15 = vld [vmem:[%s555_s2 + $0x10] sm:$0xff] }
   0x6   :  { %384 = vmatprep.subr.mxu0 %v29_v4  ;;  %v25_v16 = vld [vmem:[%s554_s1 + $0x28] sm:$0xff]  ;;  %v26_v18 = vld [vmem:[%s554_s1 + $0x30] sm:$0xff]  ;;  %v32_v19 = vld [vmem:[%s555_s2] sm:$0xff] }
   0x7   :  { %385 = vmatpush3.msra.mxu0 %v29_v4  ;;  %72 = vperm.xlu0 %420, %v38_v9   ;;  %v33_v17 = vld [vmem:[%s555_s2 + $0x8] sm:$0xff]  ;;  %v27_v20 = vld [vmem:[%s554_s1 + $0x38] sm:$0xff]  ;;  %v220_v21 = vld [vmem:[%s556_s4] sm:$0xff] }
   0x8   :  { %386 = vmatprep.subr.mxu0 %v28_v5  ;;  %62 = vperm.xlu1 %421, %v36_v11   ;;  %v221_v22 = vld [vmem:[%s556_s4 + $0x8] sm:$0xff]  ;;  %v218_v23 = vld [vmem:[%s557_s3] sm:$0xff] }
   0x9   :  { %387 = vmatpush3.msra.mxu0 %v28_v5  ;;  %416 = vmatprep.mubr.msk.f32.mxu1 %vm232_vm1, %v218_v23  ;;  %v219_v56 = vld [vmem:[%s557_s3 + $0x8] sm:$0xff] }
   0xa   :  { %389 = vmatmul.mubr.msk.f32.vlgmr.msra.gmra.mxu0 %vm80_vm0, %v21_v8 }
   0xb   :  { %391 = vmatprep.mubr.msk.f32.mxu0 %vm80_vm0, %v22_v10  ;;  %57 = vperm.xlu0 %420, %v35_v13  }
   0xc   :  { %52 = vperm.xlu1 %421, %v34_v15  }
   0xe   :  { %392 = vmatmul.mubr.msk.f32.gmra.mxu0 %vm80_vm0, %v23_v12 }
   0xf   :  { %394 = vmatprep.mubr.msk.f32.mxu0 %vm80_vm0, %v24_v14  ;;  %47 = vperm.xlu0 %420, %v33_v17  }
  0x10   :  { %42 = vperm.xlu1 %421, %v32_v19  }
  0x12   :  { %395 = vmatmul.mubr.msk.f32.gmra.mxu0 %vm80_vm0, %v25_v16 }
  0x13   :  { %397 = vmatprep.mubr.msk.f32.mxu0 %vm80_vm0, %v26_v18  ;;  %224 = vperm.xlu0 %420, %v220_v21  }
  0x14   :  { %229 = vperm.xlu1 %421, %v221_v22  }
  0x16   :  { %398 = vmatmul.mubr.msk.f32.gmra.mxu0 %vm80_vm0, %v27_v20 }
  0x7e   :  { %v78_v25 = vpop.permute.xlu0 %77 }
  0x7f   :  { %v68_v27 = vpop.permute.xlu1 %67 }
  0x82   :  { %v73_v30 = vpop.permute.xlu0 %72 }
  0x83   :  { %v63_v32 = vpop.permute.xlu1 %62 }
  0x86   :  { %v58_v36 = vpop.permute.xlu0 %57 }
  0x87   :  { %v53_v41 = vpop.permute.xlu1 %52 }
  0x8a   :  { %v48_v46 = vpop.permute.xlu0 %47 }
  0x8b   :  { %v43_v49 = vpop.permute.xlu1 %42 }
  0x8e   :  { %v225_v60 = vpop.permute.xlu0 %224 }
  0x8f   :  { %v230_v57 = vpop.permute.xlu1 %229 }
  0xca   :  { %v390_v24 = vpop.f32.mrf.mxu0 }
  0xcb   :  { %v177_v50 = vadd.f32 %v390_v24, %v48_v46 }
  0xcc   :  { %v171_v26 = vpop.f32.mrf.mxu0 }
  0xcd   :  { %v172_v52 = vadd.f32 %v171_v26, %v43_v49  ;;  %v211_v54 = vmax.f32 %v177_v50, 0.0 }
  0xce   :  { %v393_v28 = vpop.f32.mrf.mxu0 }
  0xcf   :  { %v187_v44 = vadd.f32 %v393_v28, %v58_v36  ;;  %v210_v55 = vmax.f32 %v172_v52, 0.0 }
  0xd0   :  { %v181_v29 = vpop.f32.mrf.mxu0 }
  0xd1   :  { %v182_v47 = vadd.f32 %v181_v29, %v53_v41  ;;  %v213_v51 = vmax.f32 %v187_v44, 0.0 }
  0xd2   :  { %v396_v31 = vpop.f32.mrf.mxu0 }
  0xd3   :  { %v197_v38 = vadd.f32 %v396_v31, %v68_v27  ;;  %v212_v53 = vmax.f32 %v182_v47, 0.0 }
  0xd4   :  { %v191_v33 = vpop.f32.mrf.mxu0 }
  0xd5   :  { %v192_v42 = vadd.f32 %v191_v33, %v63_v32  ;;  %v215_v45 = vmax.f32 %v197_v38, 0.0 }
  0xd6   :  { %v399_v34 = vpop.f32.mrf.mxu0 }
  0xd7   :  { %v207_v35 = vadd.f32 %v399_v34, %v78_v25  ;;  %v214_v48 = vmax.f32 %v192_v42, 0.0 }
  0xd8   :  { %v201_v37 = vpop.f32.mrf.mxu0 }
  0xd9   :  { %v217_v39 = vmax.f32 %v207_v35, 0.0  ;;  %v202_v40 = vadd.f32 %v201_v37, %v73_v30 }
  0xdb   :  { %v216_v43 = vmax.f32 %v202_v40, 0.0  ;;  %400 = vmatprep.subr.mxu1 %v217_v39 }
  0xdc   :  { %401 = vmatpush3.msra.mxu1 %v217_v39 }
  0xdd   :  { %402 = vmatprep.subr.mxu1 %v216_v43 }
  0xde   :  { %403 = vmatpush3.msra.mxu1 %v216_v43 }
  0xdf   :  { %404 = vmatprep.subr.mxu1 %v215_v45 }
  0xe0   :  { %405 = vmatpush3.msra.mxu1 %v215_v45 }
  0xe1   :  { %406 = vmatprep.subr.mxu1 %v214_v48 }
  0xe2   :  { %407 = vmatpush3.msra.mxu1 %v214_v48 }
  0xe3   :  { %408 = vmatprep.subr.mxu1 %v213_v51 }
  0xe4   :  { %409 = vmatpush3.msra.mxu1 %v213_v51 }
  0xe5   :  { %410 = vmatprep.subr.mxu1 %v212_v53 }
  0xe6   :  { %411 = vmatpush3.msra.mxu1 %v212_v53 }
  0xe7   :  { %412 = vmatprep.subr.mxu1 %v211_v54 }
  0xe8   :  { %413 = vmatpush3.msra.mxu1 %v211_v54 }
  0xe9   :  { %414 = vmatprep.subr.mxu1 %v210_v55 }
  0xea   :  { %415 = vmatpush3.msra.mxu1 %v210_v55 }
  0xeb   :  { %417 = vmatmul.mubr.msk.f32.vlgmr.msra.gmra.mxu1 %vm232_vm1, %v219_v56 }
 0x1ab   :  { %v418_v58 = vpop.f32.mrf.mxu1 }
 0x1ac   :  { %v311_v59 = vadd.f32 %v418_v58, %v230_v57 }
 0x1ad   :  { %v305_v61 = vpop.f32.mrf.mxu1 }
 0x1ae   :  { %v306_v62 = vadd.f32 %v305_v61, %v225_v60  ;;  %v316_v63 = vsel %vm314_vm2, %v311_v59, -inf }
 0x1b0   :  { %v315_v0 = vsel %vm314_vm2, %v306_v62, -inf }
 0x1b1   :  { %v317_v1 = vmax.f32 %v315_v0, %v316_v63 }
 0x1b3   :  { %v318_v2 = vrot.slane %v317_v1, 4 }
 0x1b5   :  { %v319_v3 = vmax.f32 %v317_v1, %v318_v2 }
 0x1b7   :  { %v320_v4 = vrot.slane %v319_v3, 2 }
 0x1b9   :  { %v321_v5 = vmax.f32 %v319_v3, %v320_v4 }
 0x1bb   :  { %v322_v6 = vrot.slane %v321_v5, 1 }
 0x1bd   :  { %v323_v7 = vmax.f32 %v321_v5, %v322_v6 }
 0x1bf   :  { %v324_v8 = vsub.f32 %v306_v62, %v323_v7  ;;  %v325_v9 = vsub.f32 %v311_v59, %v323_v7 }
 0x1c1   :  { %v326_v10 = vmul.f32 1.442695, %v324_v8  ;;  %v328_v11 = vmul.f32 1.442695, %v325_v9 }
 0x1c3   :  { %422 = vpow2.f32 %v326_v10 }
 0x1c4   :  { %424 = vpow2.f32 %v328_v11 }
 0x1d0   :  { %v423_v12 = vpop.eup %422 }
 0x1d1   :  { %v425_v13 = vpop.eup %424  ;;  %v330_v14 = vsel %vm314_vm2, %v423_v12, 0.0 }
 0x1d2   :  { %v331_v15 = vsel %vm314_vm2, %v425_v13, 0.0 }
 0x1d3   :  { %v332_v16 = vadd.f32 %v331_v15, %v330_v14 }
 0x1d5   :  { %v333_v17 = vrot.slane %v332_v16, 4 }
 0x1d7   :  { %v334_v18 = vadd.f32 %v333_v17, %v332_v16 }
 0x1d9   :  { %v335_v19 = vrot.slane %v334_v18, 2 }
 0x1db   :  { %v336_v20 = vadd.f32 %v335_v19, %v334_v18 }
 0x1dd   :  { %v337_v21 = vrot.slane %v336_v20, 1 }
 0x1df   :  { %v338_v22 = vadd.f32 %v337_v21, %v336_v20 }
 0x1e1   :  { %426 = vrcp.f32 %v338_v22 }
 0x1ee   :  { %v427_v23 = vpop.eup %426 }
 0x1ef   :  { %v340_v24 = vmul.f32 %v427_v23, %v423_v12  ;;  %v341_v25 = vmul.f32 %v427_v23, %v425_v13 }
 0x1f1   :  { %342 = vst.msk [vmem:[%s558_s5] sm:$0xff] %vm314_vm2, %v340_v24  ;;  %343 = vst.msk [vmem:[%s558_s5 + $0x8] sm:$0xff] %vm314_vm2, %v341_v25 }

</bundles_post_ra>
